<compile_context>
chip_gen: v6e
topology: v6e:2x2x1
jax: 0.10.0
libtpu: 0.0.40
codegen_flags: <defaults>
</compile_context>

<pallas_src>
import jax
import jax.numpy as jnp
from jax.experimental import pallas as pl
from jax.experimental.pallas import tpu as pltpu

LANES = 128           # batch samples per lane row
MAX_TILE_ROWS = 4096  # sublane rows per grid step (4096*128*4B = 2 MiB/block)
HIDDEN = 10


def ventasnet_kernel(params_ref, x_ref, out_ref):
    # params (SMEM, f32, shape (31,)): [w1[0:10], b1[0:10], w2[0:10], b2]
    # Hoist all scalar SMEM reads out of the unrolled loop (loop-invariant).
    w1 = [params_ref[j] for j in range(HIDDEN)]
    b1 = [params_ref[HIDDEN + j] for j in range(HIDDEN)]
    w2 = [params_ref[2 * HIDDEN + j] for j in range(HIDDEN)]
    b2 = params_ref[3 * HIDDEN]

    x = x_ref[...]                                   # (tile_rows, 128) of samples
    # Fold b2 into the first term (no zeros splat, no trailing add).
    acc = jnp.maximum(x * w1[0] + b1[0], 0.0) * w2[0] + b2
    for j in range(1, HIDDEN):                       # static unroll, fused VPU terms
        acc = acc + jnp.maximum(x * w1[j] + b1[j], 0.0) * w2[j]
    out_ref[...] = acc


def _ventasnet_ref(x, w1, b1, w2, b2):
    h = jnp.maximum(x @ w1 + b1[None, :], 0.0)
    return h @ w2 + b2[None, :]


def ventasnet_forward(x, w1, b1, w2, b2, *, min_pallas_n=16384):
    """x: (N, 1) f32; w1: (1, 10); b1: (10,); w2: (10, 1); b2: (1,) -> (N, 1) f32."""
    n = x.shape[0]

    # Small-batch fast path: a fused XLA elementwise kernel beats the
    # pallas_call launch + pad/reshape/slice overhead at small N.
    if n < min_pallas_n:
        return _ventasnet_ref(x, w1, b1, w2, b2)

    # Flatten all parameters into one tiny SMEM-resident vector.
    params = jnp.concatenate(
        [w1.reshape(-1), b1.reshape(-1), w2.reshape(-1), b2.reshape(-1)]
    ).astype(jnp.float32)                            # (31,)

    # ---- Balanced, (8,128)-aligned tiling of the lane-dense batch slab. ----
    rows = pl.cdiv(n, LANES)
    # Pick grid first: at least cdiv(rows, MAX_TILE_ROWS); >=2 when there is
    # more than one sublane row of work so v7x can use both TensorCores.
    grid = max(pl.cdiv(rows, MAX_TILE_ROWS), 2 if rows > 8 else 1)
    tile_rows = ((pl.cdiv(rows, grid) + 7) // 8) * 8
    grid = pl.cdiv(rows, tile_rows)                  # re-derive after round-up
    rows_pad = grid * tile_rows
    n_pad = rows_pad * LANES

    # Tail-only pad of the flat input; the reshape is a free bitcast.
    x_flat = x.reshape(-1).astype(jnp.float32)
    xp = jnp.pad(x_flat, (0, n_pad - n)).reshape(rows_pad, LANES)

    out = pl.pallas_call(
        ventasnet_kernel,
        out_shape=jax.ShapeDtypeStruct((rows_pad, LANES), jnp.float32),
        grid_spec=pltpu.PrefetchScalarGridSpec(
            num_scalar_prefetch=0,
            grid=(grid,),
            in_specs=[
                pl.BlockSpec(memory_space=pltpu.MemorySpace.SMEM),   # params (31,)
                pl.BlockSpec((tile_rows, LANES), lambda i: (i, 0)),  # x tile
            ],
            out_specs=pl.BlockSpec((tile_rows, LANES), lambda i: (i, 0)),
        ),
        compiler_params=pltpu.CompilerParams(
            dimension_semantics=("parallel",),       # batch tiles independent
        ),
        cost_estimate=pl.CostEstimate(
            flops=51 * n_pad,            # ~5 VPU ops per hidden unit + b2 fold
            transcendentals=0,
            bytes_accessed=8 * n_pad,    # f32 in + f32 out
        ),
    )(params, xp)

    # Padded tail lanes hold the constant relu(b1)@w2 + b2; slice them away.
    return out.reshape(-1)[:n].reshape(n, 1)


if __name__ == "__main__":
    key = jax.random.PRNGKey(0)
    k_x, k_w1, k_b1, k_w2, k_b2 = jax.random.split(key, 5)

    # Deterministic parameters (shapes from nn.Linear(1,10) and nn.Linear(10,1)).
    w1 = jax.random.normal(k_w1, (1, 10), jnp.float32) * 0.5
    b1 = jax.random.normal(k_b1, (10,), jnp.float32) * 0.1
    w2 = jax.random.normal(k_w2, (10, 1), jnp.float32) * 0.5
    b2 = jax.random.normal(k_b2, (1,), jnp.float32) * 0.1

    # Small batch of scalar inputs, consistent with Linear(1, ...).
    x_small = jax.random.normal(k_x, (8, 1), jnp.float32)

    # Force the Pallas path (min_pallas_n=0) so the kernel is exercised.
    y_small = ventasnet_forward(x_small, w1, b1, w2, b2, min_pallas_n=0)
    jax.block_until_ready(y_small)
    y_small_ref = _ventasnet_ref(x_small, w1, b1, w2, b2)
    assert y_small.shape == (8, 1)
    assert jnp.allclose(y_small, y_small_ref, atol=1e-5, rtol=1e-5)

    # A slightly larger batch exercising the multi-tile (grid >= 2) path.
    x_big = jax.random.normal(k_x, (2500, 1), jnp.float32)
    y_big = ventasnet_forward(x_big, w1, b1, w2, b2, min_pallas_n=0)
    jax.block_until_ready(y_big)
    y_big_ref = _ventasnet_ref(x_big, w1, b1, w2, b2)
    assert y_big.shape == (2500, 1)
    assert jnp.allclose(y_big, y_big_ref, atol=1e-5, rtol=1e-5)

    print("KERNEL_OK")
</pallas_src>

<mosaic_0001>
module attributes {stable_mosaic.version = 11 : i64} {
  func.func @ventasnet_kernel(%arg0: i32, %arg1: memref<31xf32, #tpu.memory_space<smem>>, %arg2: memref<8x128xf32, #tpu.memory_space<vmem>>, %arg3: memref<8x128xf32, #tpu.memory_space<vmem>>) attributes {dimension_semantics = [#tpu.dimension_semantics<parallel>], iteration_bounds = array<i64: 1>, scalar_prefetch = 0 : i64, scratch_operands = 0 : i64, tpu.core_type = #tpu.core_type<tc>, window_params = [{transform_indices = @transform_0, window_bounds = array<i64: 31>}, {transform_indices = @transform_1, window_bounds = array<i64: 8, 128>}, {transform_indices = @transform_2, window_bounds = array<i64: 8, 128>}]} {
    %c0 = arith.constant 0 : index
    %0 = memref.load %arg1[%c0] : memref<31xf32, #tpu.memory_space<smem>>
    %c1 = arith.constant 1 : index
    %1 = memref.load %arg1[%c1] : memref<31xf32, #tpu.memory_space<smem>>
    %c2 = arith.constant 2 : index
    %2 = memref.load %arg1[%c2] : memref<31xf32, #tpu.memory_space<smem>>
    %c3 = arith.constant 3 : index
    %3 = memref.load %arg1[%c3] : memref<31xf32, #tpu.memory_space<smem>>
    %c4 = arith.constant 4 : index
    %4 = memref.load %arg1[%c4] : memref<31xf32, #tpu.memory_space<smem>>
    %c5 = arith.constant 5 : index
    %5 = memref.load %arg1[%c5] : memref<31xf32, #tpu.memory_space<smem>>
    %c6 = arith.constant 6 : index
    %6 = memref.load %arg1[%c6] : memref<31xf32, #tpu.memory_space<smem>>
    %c7 = arith.constant 7 : index
    %7 = memref.load %arg1[%c7] : memref<31xf32, #tpu.memory_space<smem>>
    %c8 = arith.constant 8 : index
    %8 = memref.load %arg1[%c8] : memref<31xf32, #tpu.memory_space<smem>>
    %c9 = arith.constant 9 : index
    %9 = memref.load %arg1[%c9] : memref<31xf32, #tpu.memory_space<smem>>
    %c10 = arith.constant 10 : index
    %10 = memref.load %arg1[%c10] : memref<31xf32, #tpu.memory_space<smem>>
    %c11 = arith.constant 11 : index
    %11 = memref.load %arg1[%c11] : memref<31xf32, #tpu.memory_space<smem>>
    %c12 = arith.constant 12 : index
    %12 = memref.load %arg1[%c12] : memref<31xf32, #tpu.memory_space<smem>>
    %c13 = arith.constant 13 : index
    %13 = memref.load %arg1[%c13] : memref<31xf32, #tpu.memory_space<smem>>
    %c14 = arith.constant 14 : index
    %14 = memref.load %arg1[%c14] : memref<31xf32, #tpu.memory_space<smem>>
    %c15 = arith.constant 15 : index
    %15 = memref.load %arg1[%c15] : memref<31xf32, #tpu.memory_space<smem>>
    %c16 = arith.constant 16 : index
    %16 = memref.load %arg1[%c16] : memref<31xf32, #tpu.memory_space<smem>>
    %c17 = arith.constant 17 : index
    %17 = memref.load %arg1[%c17] : memref<31xf32, #tpu.memory_space<smem>>
    %c18 = arith.constant 18 : index
    %18 = memref.load %arg1[%c18] : memref<31xf32, #tpu.memory_space<smem>>
    %c19 = arith.constant 19 : index
    %19 = memref.load %arg1[%c19] : memref<31xf32, #tpu.memory_space<smem>>
    %c20 = arith.constant 20 : index
    %20 = memref.load %arg1[%c20] : memref<31xf32, #tpu.memory_space<smem>>
    %c21 = arith.constant 21 : index
    %21 = memref.load %arg1[%c21] : memref<31xf32, #tpu.memory_space<smem>>
    %c22 = arith.constant 22 : index
    %22 = memref.load %arg1[%c22] : memref<31xf32, #tpu.memory_space<smem>>
    %c23 = arith.constant 23 : index
    %23 = memref.load %arg1[%c23] : memref<31xf32, #tpu.memory_space<smem>>
    %c24 = arith.constant 24 : index
    %24 = memref.load %arg1[%c24] : memref<31xf32, #tpu.memory_space<smem>>
    %c25 = arith.constant 25 : index
    %25 = memref.load %arg1[%c25] : memref<31xf32, #tpu.memory_space<smem>>
    %c26 = arith.constant 26 : index
    %26 = memref.load %arg1[%c26] : memref<31xf32, #tpu.memory_space<smem>>
    %c27 = arith.constant 27 : index
    %27 = memref.load %arg1[%c27] : memref<31xf32, #tpu.memory_space<smem>>
    %c28 = arith.constant 28 : index
    %28 = memref.load %arg1[%c28] : memref<31xf32, #tpu.memory_space<smem>>
    %c29 = arith.constant 29 : index
    %29 = memref.load %arg1[%c29] : memref<31xf32, #tpu.memory_space<smem>>
    %c30 = arith.constant 30 : index
    %30 = memref.load %arg1[%c30] : memref<31xf32, #tpu.memory_space<smem>>
    %c0_0 = arith.constant 0 : index
    %c0_1 = arith.constant 0 : index
    %31 = vector.load %arg2[%c0_0, %c0_1] : memref<8x128xf32, #tpu.memory_space<vmem>>, vector<8x128xf32>
    %32 = vector.broadcast %0 : f32 to vector<8x128xf32>
    %33 = arith.mulf %31, %32 : vector<8x128xf32>
    %34 = vector.broadcast %10 : f32 to vector<8x128xf32>
    %35 = arith.addf %33, %34 : vector<8x128xf32>
    %cst = arith.constant 0.000000e+00 : f32
    %36 = vector.broadcast %cst : f32 to vector<8x128xf32>
    %37 = arith.maximumf %35, %36 : vector<8x128xf32>
    %38 = vector.broadcast %20 : f32 to vector<8x128xf32>
    %39 = arith.mulf %37, %38 : vector<8x128xf32>
    %40 = vector.broadcast %30 : f32 to vector<8x128xf32>
    %41 = arith.addf %39, %40 : vector<8x128xf32>
    %42 = vector.broadcast %1 : f32 to vector<8x128xf32>
    %43 = arith.mulf %31, %42 : vector<8x128xf32>
    %44 = vector.broadcast %11 : f32 to vector<8x128xf32>
    %45 = arith.addf %43, %44 : vector<8x128xf32>
    %cst_2 = arith.constant 0.000000e+00 : f32
    %46 = vector.broadcast %cst_2 : f32 to vector<8x128xf32>
    %47 = arith.maximumf %45, %46 : vector<8x128xf32>
    %48 = vector.broadcast %21 : f32 to vector<8x128xf32>
    %49 = arith.mulf %47, %48 : vector<8x128xf32>
    %50 = arith.addf %41, %49 : vector<8x128xf32>
    %51 = vector.broadcast %2 : f32 to vector<8x128xf32>
    %52 = arith.mulf %31, %51 : vector<8x128xf32>
    %53 = vector.broadcast %12 : f32 to vector<8x128xf32>
    %54 = arith.addf %52, %53 : vector<8x128xf32>
    %cst_3 = arith.constant 0.000000e+00 : f32
    %55 = vector.broadcast %cst_3 : f32 to vector<8x128xf32>
    %56 = arith.maximumf %54, %55 : vector<8x128xf32>
    %57 = vector.broadcast %22 : f32 to vector<8x128xf32>
    %58 = arith.mulf %56, %57 : vector<8x128xf32>
    %59 = arith.addf %50, %58 : vector<8x128xf32>
    %60 = vector.broadcast %3 : f32 to vector<8x128xf32>
    %61 = arith.mulf %31, %60 : vector<8x128xf32>
    %62 = vector.broadcast %13 : f32 to vector<8x128xf32>
    %63 = arith.addf %61, %62 : vector<8x128xf32>
    %cst_4 = arith.constant 0.000000e+00 : f32
    %64 = vector.broadcast %cst_4 : f32 to vector<8x128xf32>
    %65 = arith.maximumf %63, %64 : vector<8x128xf32>
    %66 = vector.broadcast %23 : f32 to vector<8x128xf32>
    %67 = arith.mulf %65, %66 : vector<8x128xf32>
    %68 = arith.addf %59, %67 : vector<8x128xf32>
    %69 = vector.broadcast %4 : f32 to vector<8x128xf32>
    %70 = arith.mulf %31, %69 : vector<8x128xf32>
    %71 = vector.broadcast %14 : f32 to vector<8x128xf32>
    %72 = arith.addf %70, %71 : vector<8x128xf32>
    %cst_5 = arith.constant 0.000000e+00 : f32
    %73 = vector.broadcast %cst_5 : f32 to vector<8x128xf32>
    %74 = arith.maximumf %72, %73 : vector<8x128xf32>
    %75 = vector.broadcast %24 : f32 to vector<8x128xf32>
    %76 = arith.mulf %74, %75 : vector<8x128xf32>
    %77 = arith.addf %68, %76 : vector<8x128xf32>
    %78 = vector.broadcast %5 : f32 to vector<8x128xf32>
    %79 = arith.mulf %31, %78 : vector<8x128xf32>
    %80 = vector.broadcast %15 : f32 to vector<8x128xf32>
    %81 = arith.addf %79, %80 : vector<8x128xf32>
    %cst_6 = arith.constant 0.000000e+00 : f32
    %82 = vector.broadcast %cst_6 : f32 to vector<8x128xf32>
    %83 = arith.maximumf %81, %82 : vector<8x128xf32>
    %84 = vector.broadcast %25 : f32 to vector<8x128xf32>
    %85 = arith.mulf %83, %84 : vector<8x128xf32>
    %86 = arith.addf %77, %85 : vector<8x128xf32>
    %87 = vector.broadcast %6 : f32 to vector<8x128xf32>
    %88 = arith.mulf %31, %87 : vector<8x128xf32>
    %89 = vector.broadcast %16 : f32 to vector<8x128xf32>
    %90 = arith.addf %88, %89 : vector<8x128xf32>
    %cst_7 = arith.constant 0.000000e+00 : f32
    %91 = vector.broadcast %cst_7 : f32 to vector<8x128xf32>
    %92 = arith.maximumf %90, %91 : vector<8x128xf32>
    %93 = vector.broadcast %26 : f32 to vector<8x128xf32>
    %94 = arith.mulf %92, %93 : vector<8x128xf32>
    %95 = arith.addf %86, %94 : vector<8x128xf32>
    %96 = vector.broadcast %7 : f32 to vector<8x128xf32>
    %97 = arith.mulf %31, %96 : vector<8x128xf32>
    %98 = vector.broadcast %17 : f32 to vector<8x128xf32>
    %99 = arith.addf %97, %98 : vector<8x128xf32>
    %cst_8 = arith.constant 0.000000e+00 : f32
    %100 = vector.broadcast %cst_8 : f32 to vector<8x128xf32>
    %101 = arith.maximumf %99, %100 : vector<8x128xf32>
    %102 = vector.broadcast %27 : f32 to vector<8x128xf32>
    %103 = arith.mulf %101, %102 : vector<8x128xf32>
    %104 = arith.addf %95, %103 : vector<8x128xf32>
    %105 = vector.broadcast %8 : f32 to vector<8x128xf32>
    %106 = arith.mulf %31, %105 : vector<8x128xf32>
    %107 = vector.broadcast %18 : f32 to vector<8x128xf32>
    %108 = arith.addf %106, %107 : vector<8x128xf32>
    %cst_9 = arith.constant 0.000000e+00 : f32
    %109 = vector.broadcast %cst_9 : f32 to vector<8x128xf32>
    %110 = arith.maximumf %108, %109 : vector<8x128xf32>
    %111 = vector.broadcast %28 : f32 to vector<8x128xf32>
    %112 = arith.mulf %110, %111 : vector<8x128xf32>
    %113 = arith.addf %104, %112 : vector<8x128xf32>
    %114 = vector.broadcast %9 : f32 to vector<8x128xf32>
    %115 = arith.mulf %31, %114 : vector<8x128xf32>
    %116 = vector.broadcast %19 : f32 to vector<8x128xf32>
    %117 = arith.addf %115, %116 : vector<8x128xf32>
    %cst_10 = arith.constant 0.000000e+00 : f32
    %118 = vector.broadcast %cst_10 : f32 to vector<8x128xf32>
    %119 = arith.maximumf %117, %118 : vector<8x128xf32>
    %120 = vector.broadcast %29 : f32 to vector<8x128xf32>
    %121 = arith.mulf %119, %120 : vector<8x128xf32>
    %122 = arith.addf %113, %121 : vector<8x128xf32>
    %c0_11 = arith.constant 0 : index
    %c0_12 = arith.constant 0 : index
    %123 = vector.load %arg3[%c0_11, %c0_12] : memref<8x128xf32, #tpu.memory_space<vmem>>, vector<8x128xf32>
    tpu.vector_store %arg3[%c0_11, %c0_12], %122 {strides = array<i32>} : memref<8x128xf32, #tpu.memory_space<vmem>>, vector<8x128xf32>,
    return
  }
  func.func @transform_0(%arg0: i32) -> i32 {
    %c0_i32 = arith.constant 0 : i32
    %c0_i32_0 = arith.constant 0 : i32
    return %c0_i32 : i32
  }
  func.func @transform_1(%arg0: i32) -> (i32, i32) {
    %c0_i32 = arith.constant 0 : i32
    %c0_i32_0 = arith.constant 0 : i32
    return %arg0, %c0_i32 : i32, i32
  }
  func.func @transform_2(%arg0: i32) -> (i32, i32) {
    %c0_i32 = arith.constant 0 : i32
    %c0_i32_0 = arith.constant 0 : i32
    return %arg0, %c0_i32 : i32, i32
  }
}

</mosaic_0001>

<bundles_post_ra>
// kernel: tpu_custom_call.1
= control target key start
LH: loop header
LB: loop body
LE: loop exit
PB: predicated region body
PF: predicated region fallthrough
CT: control target
= control target key end

     0   :  { %7 = vsyncpa [#allocation5], 0  ;;  %s357_s0 = inlined_call_operand.hbm [shape: f32[31], index: 0, kind: input, shape index: {}]   ;;  %s358_s1 = inlined_call_operand.hbm [shape: f32[8,128], index: 1, kind: input, shape index: {}]   ;;  %s359_s2 = inlined_call_operand.hbm [shape: f32[8,128], index: 2, kind: output, shape index: {}]  }
   0x1   :  { %8 = vsyncpa [#allocation3], 0 }
   0x2   :  { %9 = vsyncpa [#allocation4], 0  ;;  %s252_s9 = smov [#allocation2]   ;;  %s253_s12 = smov [#allocation6]  }
   0x3   :  { %17 = dma.hbm_to_smem %s357_s0, 16, %s252_s9, [#allocation5]  }
   0x4   :  { %s24_s13 = sshll.u32 %s253_s12, 4  ;;  %s25_s13 = int_to_ptr.vmem [resolvable:$true] %s24_s13 }
   0x5   :  { %s214_s14 = scalar_lea.vmem %s25_s13, 128  ;;  %p219_p1 = scmp.lt.s32.totalorder %s25_s13, %s25_s13 }
   0x6   :  { %p215_p0 = scmp.ne.s32.totalorder %s25_s13, %s214_s14  ;;  %p220_p2 = scmp.lt.s32.totalorder %s214_s14, %s214_s14 }
   0x8   :  { %p221_p3 = por %p220_p2, %p219_p1 }
   0xa   :  { %p222_p4 = pnand %p221_p3, %p215_p0 }
   0xc   :  { %225 = shalt.err (!%p222_p4)
}
   0xd   :  { %27 = dma.hbm_to_vmem [thread:$0]  %s358_s1, 128, %s25_s13, [#allocation3]  }
   0xe   :  { %246 = dma.done.wait [#allocation5], 16  }
   0xf   :  { %247 = vsyncadd [#allocation5], 4294967280 }
  0x10   :  { %248 = dma.done.wait [#allocation3], 128  }
  0x11   :  { %249 = vsyncadd [#allocation3], 4294967168 }
  0x12   :  { %34 = sfence }
  0x13   :  { %s35_s0 = sld [smem:[#allocation2]]  ;;  %v290_v0 = vld [vmem:[#allocation6] sm:$0xff] }
  0x14   :  { %s165_s17 = sld [smem:[#allocation2 + $0x1]] }
  0x15   :  { %s166_s18 = sld [smem:[#allocation2 + $0x2]] }
  0x16   :  { %s276_s19 = sld [smem:[#allocation2 + $0x3]] }
  0x17   :  { %s278_s20 = sld [smem:[#allocation2 + $0x4]] }
  0x18   :  { %s280_s21 = sld [smem:[#allocation2 + $0x5]] }
  0x19   :  { %s282_s22 = sld [smem:[#allocation2 + $0x6]]  ;;  %v67_v1 = vstv %s35_s0 }
  0x1a   :  { %s284_s23 = sld [smem:[#allocation2 + $0x7]]  ;;  %v76_v2 = vstv %s165_s17  ;;  %v68_v3 = vmul.f32 %v67_v1, %v290_v0  ;;  %s254_s17 = smov [#allocation7]  }
  0x1b   :  { %s174_s24 = sld [smem:[#allocation2 + $0xa]]  ;;  %v84_v5 = vstv %s166_s18  ;;  %v77_v6 = vmul.f32 %v76_v2, %v290_v0  ;;  %s155_s18 = sshll.u32 %s254_s17, 4  ;;  %s156_s18 = int_to_ptr.vmem [resolvable:$true] %s155_s18 }
  0x1c   :  { %s286_s1 = sld [smem:[#allocation2 + $0x8]]  ;;  %v92_v8 = vstv %s276_s19  ;;  %v85_v10 = vmul.f32 %v84_v5, %v290_v0  ;;  %s226_s19 = scalar_lea.vmem %s156_s18, 128 }
  0x1d   :  { %s175_s25 = sld [smem:[#allocation2 + $0xb]]  ;;  %v100_v12 = vstv %s278_s20  ;;  %v93_v14 = vmul.f32 %v92_v8, %v290_v0  ;;  %p227_p5 = scmp.ne.s32.totalorder %s156_s18, %s226_s19 }
  0x1e   :  { %s288_s26 = sld [smem:[#allocation2 + $0x9]]  ;;  %v108_v16 = vstv %s280_s21  ;;  %v101_v19 = vmul.f32 %v100_v12, %v290_v0  ;;  %p231_p6 = scmp.lt.s32.totalorder %s156_s18, %s156_s18 }
  0x1f   :  { %s176_s27 = sld [smem:[#allocation2 + $0xc]]  ;;  %v116_v20 = vstv %s282_s22  ;;  %v109_v25 = vmul.f32 %v108_v16, %v290_v0  ;;  %p232_p7 = scmp.lt.s32.totalorder %s226_s19, %s226_s19 }
  0x20   :  { %s292_s28 = sld [smem:[#allocation2 + $0xd]]  ;;  %v124_v26 = vstv %s284_s23  ;;  %v117_v29 = vmul.f32 %v116_v20, %v290_v0 }
  0x21   :  { %s294_s29 = sld [smem:[#allocation2 + $0xe]]  ;;  %v69_v4 = vstv %s174_s24  ;;  %v125_v36 = vmul.f32 %v124_v26, %v290_v0  ;;  %p233_p8 = por %p232_p7, %p231_p6 }
  0x22   :  { %s296_s30 = sld [smem:[#allocation2 + $0xf]]  ;;  %v70_v9 = vadd.f32 %v69_v4, %v68_v3  ;;  %v132_v33 = vstv %s286_s1 }
  0x23   :  { %s299_s3 = sld [smem:[#allocation2 + $0x14]]  ;;  %v78_v7 = vstv %s175_s25  ;;  %v133_v44 = vmul.f32 %v132_v33, %v290_v0  ;;  %p234_p9 = pnand %p233_p8, %p227_p5 }
  0x24   :  { %s301_s4 = sld [smem:[#allocation2 + $0x10]]  ;;  %v79_v13 = vadd.f32 %v78_v7, %v77_v6  ;;  %v71_v17 = vmax.f32 %v70_v9, 0.0  ;;  %v140_v40 = vstv %s288_s26 }
  0x25   :  { %s304_s5 = sld [smem:[#allocation2 + $0x15]]  ;;  %v86_v11 = vstv %s176_s27  ;;  %v141_v51 = vmul.f32 %v140_v40, %v290_v0 }
  0x26   :  { %s307_s6 = sld [smem:[#allocation2 + $0x11]]  ;;  %v94_v15 = vstv %s292_s28  ;;  %v87_v18 = vadd.f32 %v86_v11, %v85_v10  ;;  %v80_v23 = vmax.f32 %v79_v13, 0.0 }
  0x27   :  { %s310_s7 = sld [smem:[#allocation2 + $0x16]]  ;;  %v102_v22 = vstv %s294_s29  ;;  %v95_v24 = vadd.f32 %v94_v15, %v93_v14 }
  0x28   :  { %s313_s8 = sld [smem:[#allocation2 + $0x12]]  ;;  %v110_v28 = vstv %s296_s30  ;;  %v88_v31 = vmax.f32 %v87_v18, 0.0  ;;  %v103_v32 = vadd.f32 %v102_v22, %v101_v19 }
  0x29   :  { %s316_s9 = sld [smem:[#allocation2 + $0x17]]  ;;  %v72_v21 = vstv %s299_s3  ;;  %v96_v38 = vmax.f32 %v95_v24, 0.0  ;;  %v111_v39 = vadd.f32 %v110_v28, %v109_v25 }
  0x2a   :  { %s320_s10 = sld [smem:[#allocation2 + $0x18]]  ;;  %v73_v30 = vmul.f32 %v72_v21, %v71_v17  ;;  %v118_v35 = vstv %s301_s4  ;;  %v104_v47 = vmax.f32 %v103_v32, 0.0 }
  0x2b   :  { %s194_s11 = sld [smem:[#allocation2 + $0x1e]]  ;;  %v81_v27 = vstv %s304_s5  ;;  %v119_v48 = vadd.f32 %v118_v35, %v117_v29  ;;  %v112_v54 = vmax.f32 %v111_v39, 0.0 }
  0x2c   :  { %s326_s12 = sld [smem:[#allocation2 + $0x13]]  ;;  %v82_v37 = vmul.f32 %v81_v27, %v80_v23  ;;  %v126_v43 = vstv %s307_s6 }
  0x2d   :  { %s330_s13 = sld [smem:[#allocation2 + $0x19]]  ;;  %v89_v34 = vstv %s310_s7  ;;  %v127_v55 = vadd.f32 %v126_v43, %v125_v36  ;;  %v120_v60 = vmax.f32 %v119_v48, 0.0 }
  0x2e   :  { %s336_s14 = sld [smem:[#allocation2 + $0x1a]]  ;;  %v90_v46 = vmul.f32 %v89_v34, %v88_v31  ;;  %v134_v50 = vstv %s313_s8 }
  0x2f   :  { %s342_s15 = sld [smem:[#allocation2 + $0x1b]]  ;;  %v97_v42 = vstv %s316_s9  ;;  %v135_v61 = vadd.f32 %v134_v50, %v133_v44  ;;  %v128_v2 = vmax.f32 %v127_v55, 0.0 }
  0x30   :  { %s192_s16 = sld [smem:[#allocation2 + $0x1c]]  ;;  %v105_v49 = vstv %s320_s10  ;;  %v98_v53 = vmul.f32 %v97_v42, %v96_v38 }
  0x31   :  { %v74_v41 = vstv %s194_s11  ;;  %s193_s0 = sld [smem:[#allocation2 + $0x1d]]  ;;  %v106_v59 = vmul.f32 %v105_v49, %v104_v47  ;;  %v136_v6 = vmax.f32 %v135_v61, 0.0 }
  0x32   :  { %v75_v45 = vadd.f32 %v74_v41, %v73_v30  ;;  %v142_v57 = vstv %s326_s12 }
  0x33   :  { %v113_v56 = vstv %s330_s13  ;;  %v143_v3 = vadd.f32 %v142_v57, %v141_v51 }
  0x34   :  { %v83_v52 = vadd.f32 %v82_v37, %v75_v45  ;;  %v121_v62 = vstv %s336_s14  ;;  %v114_v1 = vmul.f32 %v113_v56, %v112_v54 }
  0x35   :  { %v129_v4 = vstv %s342_s15  ;;  %v122_v0 = vmul.f32 %v121_v62, %v120_v60  ;;  %v144_v10 = vmax.f32 %v143_v3, 0.0 }
  0x36   :  { %v91_v58 = vadd.f32 %v90_v46, %v83_v52  ;;  %v137_v7 = vstv %s192_s16  ;;  %v130_v9 = vmul.f32 %v129_v4, %v128_v2 }
  0x37   :  { %v145_v11 = vstv %s193_s0  ;;  %v138_v13 = vmul.f32 %v137_v7, %v136_v6 }
  0x38   :  { %v99_v63 = vadd.f32 %v98_v53, %v91_v58  ;;  %v146_v15 = vmul.f32 %v145_v11, %v144_v10 }
  0x3a   :  { %v107_v5 = vadd.f32 %v106_v59, %v99_v63 }
  0x3c   :  { %v115_v8 = vadd.f32 %v114_v1, %v107_v5 }
  0x3e   :  { %v123_v12 = vadd.f32 %v122_v0, %v115_v8 }
  0x40   :  { %v131_v14 = vadd.f32 %v130_v9, %v123_v12 }
  0x42   :  { %v139_v16 = vadd.f32 %v138_v13, %v131_v14 }
  0x44   :  { %v147_v17 = vadd.f32 %v146_v15, %v139_v16 }
  0x46   :  { %148 = vst [vmem:[#allocation7] sm:$0xff] %v147_v17 }
  0x47   :  { %237 = shalt.err (!%p234_p9)
}
  0x48   :  { %158 = dma.vmem_to_hbm [thread:$0]  %s156_s18, 128, %s359_s2, [#allocation4]  }
  0x49   :  { %250 = dma.done.wait [#allocation4], 128  }
  0x4a   :  { %251 = vsyncadd [#allocation4], 4294967168 }
  0x4b   :  { %162 = vsyncpa [#allocation3], 1 }
  0x4c   :  { %163 = vsyncpa [#allocation4], 1 }
  0x4d   :  { %164 = vsyncpa [#allocation5], 1 }

</bundles_post_ra>
